<compile_context>
chip_gen: v7x
topology: tpu7x:2x2x1
jax: 0.10.0
libtpu: 0.0.40
codegen_flags: <defaults>
</compile_context>

<pallas_src>
import jax
import jax.numpy as jnp
from jax.experimental import pallas as pl
from jax.experimental.pallas import tpu as pltpu

EPS = 1e-5  # nn.LayerNorm default


def prenorm_kernel(x_ref, gamma_ref, beta_ref, w_ref, b_ref, o_ref, yn_ref):
    # Grid = (row tiles, weight-column tiles). LayerNorm of the current row
    # tile is computed once (j == 0), stored in VMEM scratch in the MXU dtype,
    # and reused for every weight-column tile.
    @pl.when(pl.program_id(1) == 0)
    def _():
        x = x_ref[...].astype(jnp.float32)
        mean = jnp.mean(x, axis=-1, keepdims=True)
        centered = x - mean
        var = jnp.mean(centered * centered, axis=-1, keepdims=True)
        xn = centered * jax.lax.rsqrt(var + EPS)
        y = xn * gamma_ref[...].astype(jnp.float32) + beta_ref[...].astype(jnp.float32)
        yn_ref[...] = y.astype(yn_ref.dtype)

    # MXU matmul: (tm, D) @ (D, tn), f32 accumulation, no per-step weight cast.
    out = jnp.dot(yn_ref[...], w_ref[...], preferred_element_type=jnp.float32)
    out = out + b_ref[...].astype(jnp.float32)
    o_ref[...] = out.astype(o_ref.dtype)


def _sublane(dtype):
    return {4: 8, 2: 16, 1: 32}[jnp.dtype(dtype).itemsize]


def _round_up(a, m):
    return (a + m - 1) // m * m


def _chip_defaults():
    """Per-generation (tm, vmem_limit, num_tensorcores) defaults."""
    kind = ""
    try:
        kind = jax.devices()[0].device_kind.lower()
    except Exception:
        pass
    if "v7" in kind:
        # 64 MiB physical VMEM per TC -> budget well below it; 2 TCs/chip.
        return {"tm": 1024, "vmem": 56 * 1024 * 1024, "num_tc": 2}
    if "v6" in kind:
        # ~680 bf16 flops/byte per TC -> need tm >= ~700 to be MXU-bound.
        return {"tm": 1024, "vmem": 112 * 1024 * 1024, "num_tc": 1}
    if "v5" in kind:
        # ~240 flops/byte ratio -> tm=512 clears the roofline.
        return {"tm": 512, "vmem": 96 * 1024 * 1024, "num_tc": 1}
    # Unknown chip: conservative.
    return {"tm": 512, "vmem": 64 * 1024 * 1024, "num_tc": 1}


def _vmem_bytes(tm, tn, D, x_item, mxu_item, out_item):
    """Rough resident-set estimate (double-buffered inputs/outputs + scratch)."""
    x_blk = 2 * tm * D * x_item
    w_blk = 2 * D * tn * mxu_item
    o_blk = 2 * tm * tn * out_item
    yn = tm * D * mxu_item
    small = 8 * D * 4  # gamma / beta / bias blocks (generous)
    return x_blk + w_blk + o_blk + yn + small


def prenorm(x, gamma, beta, w, b, *, tm=None, tn=None, mxu_dtype=None,
            vmem_limit_bytes=None, weight_buffers=None):
    """x: (B, S, D) -> (B, S, D). Fused LayerNorm + Linear in one pallas_call."""
    B, S, D = x.shape
    N = B * S
    defaults = _chip_defaults()

    # MXU dtype: bf16 path when the weight is already bf16, else keep f32.
    # Pass mxu_dtype=jnp.bfloat16 explicitly to opt into downcasting f32
    # weights (f32 accumulation is kept either way).
    if mxu_dtype is None:
        mxu_dtype = jnp.bfloat16 if w.dtype == jnp.bfloat16 else jnp.float32
    w = w.astype(mxu_dtype)  # one-time cast outside the kernel

    if vmem_limit_bytes is None:
        vmem_limit_bytes = defaults["vmem"]

    sub = max(_sublane(x.dtype), _sublane(mxu_dtype))

    # ---- column tiling: keep the output lane-dense (multiple of 128) --------
    if tn is None:
        if D <= 1024:
            tn, D_out = D, D                       # single column tile, full width
        else:
            D_out = _round_up(D, 128)              # pad columns up to 128 multiple
            tn = next(c for c in (512, 256, 128) if D_out % c == 0)
    else:
        D_out = _round_up(D, tn)

    # ---- row tiling ----------------------------------------------------------
    tm0 = defaults["tm"] if tm is None else tm
    tm0 = min(_round_up(tm0, sub), _round_up(N, sub))
    # Guarantee >= 2 row tiles on multi-TC chips so the "parallel" axis shards.
    if defaults["num_tc"] > 1 and N > sub:
        tm0 = min(tm0, _round_up(pl.cdiv(N, 2), sub))
    tm0 = max(tm0, sub)
    # Shrink until the resident working set fits the VMEM budget.
    budget = int(vmem_limit_bytes * 0.85)
    x_item = jnp.dtype(x.dtype).itemsize
    mxu_item = jnp.dtype(mxu_dtype).itemsize
    while tm0 > sub and _vmem_bytes(tm0, tn, D, x_item, mxu_item, x_item) > budget:
        tm0 = max(sub, _round_up(tm0 // 2, sub))
    # Snap tm down to a sublane multiple that divides N (avoids the pad/slice
    # HBM round trip) -- but only if the snap keeps >= half the target tile.
    tm_final = tm0
    cand = (tm0 // sub) * sub
    while cand >= sub:
        if N % cand == 0:
            if 2 * cand >= tm0:
                tm_final = cand
            break
        cand -= sub
    tm = tm_final

    x2 = x.reshape(N, D)
    N_pad = _round_up(N, tm)
    if N_pad != N:
        # TODO(synk): a masked ragged last tile would avoid this copy entirely;
        # zero rows are LN-safe (var=0 -> rsqrt(eps)) and sliced off below.
        x2 = jnp.pad(x2, ((0, N_pad - N), (0, 0)))

    if D_out != D:
        w = jnp.pad(w, ((0, 0), (0, D_out - D)))
        b = jnp.pad(b, (0, D_out - D))

    gamma2 = gamma.reshape(1, D)
    beta2 = beta.reshape(1, D)
    b2 = b.reshape(1, D_out)

    w_spec_kwargs = {}
    if weight_buffers is not None:
        # Optional deeper pipelining of the weight stream (sweepable).
        w_spec_kwargs["pipeline_mode"] = pl.Buffered(weight_buffers)

    grid = (N_pad // tm, D_out // tn)

    cost = pl.CostEstimate(
        flops=2 * N_pad * D * D_out + 10 * N_pad * D,
        transcendentals=N_pad,  # one rsqrt per row
        bytes_accessed=(x2.size * x_item
                        + grid[0] * int(w.size) * mxu_item   # weight re-streamed per row tile
                        + N_pad * D_out * x_item),
    )

    out2 = pl.pallas_call(
        prenorm_kernel,
        out_shape=jax.ShapeDtypeStruct((N_pad, D_out), x.dtype),
        grid_spec=pltpu.PrefetchScalarGridSpec(
            num_scalar_prefetch=0,
            grid=grid,
            in_specs=[
                pl.BlockSpec((tm, D), lambda i, j: (i, 0)),   # x rows (resident over j)
                pl.BlockSpec((1, D), lambda i, j: (0, 0)),    # gamma
                pl.BlockSpec((1, D), lambda i, j: (0, 0)),    # beta
                pl.BlockSpec((D, tn), lambda i, j: (0, j), **w_spec_kwargs),  # weight cols
                pl.BlockSpec((1, tn), lambda i, j: (0, j)),   # bias column block
            ],
            out_specs=pl.BlockSpec((tm, tn), lambda i, j: (i, j)),
            scratch_shapes=[pltpu.VMEM((tm, D), mxu_dtype)],  # cached LayerNorm result
        ),
        compiler_params=pltpu.CompilerParams(
            dimension_semantics=("parallel", "arbitrary"),
            vmem_limit_bytes=vmem_limit_bytes,
        ),
        cost_estimate=cost,
    )(x2, gamma2, beta2, w, b2)

    out2 = out2[:N, :D]
    return out2.reshape(B, S, D)


def prenorm_ref(x, gamma, beta, w, b, *, mxu_dtype=None):
    """Pure-JAX reference: LayerNorm(dim) then Linear(dim, dim), same dtype path."""
    if mxu_dtype is None:
        mxu_dtype = jnp.bfloat16 if w.dtype == jnp.bfloat16 else jnp.float32
    xf = x.astype(jnp.float32)
    mean = jnp.mean(xf, axis=-1, keepdims=True)
    var = jnp.mean((xf - mean) ** 2, axis=-1, keepdims=True)
    xn = (xf - mean) / jnp.sqrt(var + EPS)
    y = xn * gamma.astype(jnp.float32) + beta.astype(jnp.float32)
    out = jnp.dot(y.astype(mxu_dtype), w.astype(mxu_dtype),
                  preferred_element_type=jnp.float32)
    out = out + b.astype(jnp.float32)
    return out.astype(x.dtype)


if __name__ == "__main__":
    key = jax.random.PRNGKey(0)
    B, S, D = 2, 8, 32
    kx, kw, kb = jax.random.split(key, 3)

    # --- bf16 path (exercises the MXU-friendly optimized path) ---
    x = jax.random.normal(kx, (B, S, D), dtype=jnp.float32).astype(jnp.bfloat16)
    gamma = jnp.ones((D,), dtype=jnp.float32)       # LayerNorm defaults
    beta = jnp.zeros((D,), dtype=jnp.float32)
    # fn = Linear(D, D), deterministic synthetic init
    w = (jax.random.normal(kw, (D, D), dtype=jnp.float32)
         * (1.0 / jnp.sqrt(D))).astype(jnp.bfloat16)
    b = (jax.random.normal(kb, (D,), dtype=jnp.float32) * 0.01).astype(jnp.bfloat16)

    out = jax.block_until_ready(prenorm(x, gamma, beta, w, b))
    ref = prenorm_ref(x, gamma, beta, w, b)
    assert out.shape == (B, S, D) and out.dtype == x.dtype
    err = jnp.max(jnp.abs(out.astype(jnp.float32) - ref.astype(jnp.float32)))
    assert err < 2e-2, f"bf16 mismatch vs reference: max abs err {err}"

    # --- f32 path (matmul stays f32, tighter tolerance) ---
    xf = x.astype(jnp.float32)
    wf = w.astype(jnp.float32)
    bf = b.astype(jnp.float32)
    out_f = jax.block_until_ready(prenorm(xf, gamma, beta, wf, bf))
    ref_f = prenorm_ref(xf, gamma, beta, wf, bf)
    assert jnp.allclose(out_f, ref_f, atol=1e-4, rtol=1e-4), "f32 mismatch vs reference"

    print("KERNEL_OK")
</pallas_src>

<mosaic_0001>
module attributes {stable_mosaic.version = 11 : i64} {
  func.func @prenorm_kernel(%arg0: i32, %arg1: i32, %arg2: memref<16x32xbf16, #tpu.memory_space<vmem>>, %arg3: memref<1x32xf32, #tpu.memory_space<vmem>>, %arg4: memref<1x32xf32, #tpu.memory_space<vmem>>, %arg5: memref<32x32xbf16, #tpu.memory_space<vmem>>, %arg6: memref<1x32xbf16, #tpu.memory_space<vmem>>, %arg7: memref<16x32xbf16, #tpu.memory_space<vmem>>, %arg8: memref<16x32xbf16, #tpu.memory_space<vmem>>) attributes {dimension_semantics = [#tpu.dimension_semantics<parallel>, #tpu.dimension_semantics<arbitrary>], iteration_bounds = array<i64: 1, 1>, scalar_prefetch = 0 : i64, scratch_operands = 1 : i64, tpu.core_type = #tpu.core_type<tc>, window_params = [{transform_indices = @transform_0, window_bounds = array<i64: 16, 32>}, {pipeline_mode = #tpu.pipeline_mode<synchronous>, transform_indices = @transform_1, window_bounds = array<i64: 1, 32>}, {pipeline_mode = #tpu.pipeline_mode<synchronous>, transform_indices = @transform_2, window_bounds = array<i64: 1, 32>}, {transform_indices = @transform_3, window_bounds = array<i64: 32, 32>}, {transform_indices = @transform_4, window_bounds = array<i64: 1, 32>}, {transform_indices = @transform_5, window_bounds = array<i64: 16, 32>}]} {
    %c0_i32 = arith.constant 0 : i32
    %0 = arith.cmpi eq, %arg1, %c0_i32 : i32
    %1 = arith.extui %0 : i1 to i32
    %c0_i32_0 = arith.constant 0 : i32
    %2 = arith.cmpi ne, %1, %c0_i32_0 : i32
    scf.if %2 {
      %c0_8 = arith.constant 0 : index
      %c0_9 = arith.constant 0 : index
      %12 = vector.load %arg2[%c0_8, %c0_9] : memref<16x32xbf16, #tpu.memory_space<vmem>>, vector<16x32xbf16>
      %13 = arith.extf %12 : vector<16x32xbf16> to vector<16x32xf32>
      %cst_10 = arith.constant dense<0.000000e+00> : vector<16xf32>
      %14 = vector.multi_reduction <add>, %13, %cst_10 [1] : vector<16x32xf32> to vector<16xf32>
      %15 = vector.shape_cast %14 : vector<16xf32> to vector<16x1xf32>
      %cst_11 = arith.constant 3.200000e+01 : f32
      %16 = vector.broadcast %cst_11 : f32 to vector<16x1xf32>
      %17 = arith.divf %15, %16 : vector<16x1xf32>
      %18 = vector.broadcast %17 : vector<16x1xf32> to vector<16x32xf32>
      %19 = arith.subf %13, %18 : vector<16x32xf32>
      %20 = arith.mulf %19, %19 : vector<16x32xf32>
      %cst_12 = arith.constant dense<0.000000e+00> : vector<16xf32>
      %21 = vector.multi_reduction <add>, %20, %cst_12 [1] : vector<16x32xf32> to vector<16xf32>
      %22 = vector.shape_cast %21 : vector<16xf32> to vector<16x1xf32>
      %cst_13 = arith.constant 3.200000e+01 : f32
      %23 = vector.broadcast %cst_13 : f32 to vector<16x1xf32>
      %24 = arith.divf %22, %23 : vector<16x1xf32>
      %cst_14 = arith.constant 9.99999974E-6 : f32
      %25 = vector.broadcast %cst_14 : f32 to vector<16x1xf32>
      %26 = arith.addf %24, %25 : vector<16x1xf32>
      %27 = math.rsqrt %26 : vector<16x1xf32>
      %28 = vector.broadcast %27 : vector<16x1xf32> to vector<16x32xf32>
      %29 = arith.mulf %19, %28 : vector<16x32xf32>
      %c0_15 = arith.constant 0 : index
      %c0_16 = arith.constant 0 : index
      %30 = vector.load %arg3[%c0_15, %c0_16] : memref<1x32xf32, #tpu.memory_space<vmem>>, vector<1x32xf32>
      %31 = vector.broadcast %30 : vector<1x32xf32> to vector<16x32xf32>
      %32 = arith.mulf %29, %31 : vector<16x32xf32>
      %c0_17 = arith.constant 0 : index
      %c0_18 = arith.constant 0 : index
      %33 = vector.load %arg4[%c0_17, %c0_18] : memref<1x32xf32, #tpu.memory_space<vmem>>, vector<1x32xf32>
      %34 = vector.broadcast %33 : vector<1x32xf32> to vector<16x32xf32>
      %35 = arith.addf %32, %34 : vector<16x32xf32>
      %36 = arith.truncf %35 : vector<16x32xf32> to vector<16x32xbf16>
      %c0_19 = arith.constant 0 : index
      %c0_20 = arith.constant 0 : index
      %37 = vector.load %arg8[%c0_19, %c0_20] : memref<16x32xbf16, #tpu.memory_space<vmem>>, vector<16x32xbf16>
      tpu.vector_store %arg8[%c0_19, %c0_20], %36 {strides = array<i32>} : memref<16x32xbf16, #tpu.memory_space<vmem>>, vector<16x32xbf16>,
    } else {
    }
    %c0 = arith.constant 0 : index
    %c0_1 = arith.constant 0 : index
    %3 = vector.load %arg8[%c0, %c0_1] : memref<16x32xbf16, #tpu.memory_space<vmem>>, vector<16x32xbf16>
    %c0_2 = arith.constant 0 : index
    %c0_3 = arith.constant 0 : index
    %4 = vector.load %arg5[%c0_2, %c0_3] : memref<32x32xbf16, #tpu.memory_space<vmem>>, vector<32x32xbf16>
    %cst = arith.constant dense<0.000000e+00> : vector<16x32xf32>
    %5 = tpu.matmul %3, %4, %cst {dimension_numbers = #tpu.dot_dimension_numbers<[1], [0], [0], [1], [0, 0, 1, 1], [], []>} : vector<16x32xbf16>, vector<32x32xbf16>, vector<16x32xf32> -> vector<16x32xf32>
    %c0_4 = arith.constant 0 : index
    %c0_5 = arith.constant 0 : index
    %6 = vector.load %arg6[%c0_4, %c0_5] : memref<1x32xbf16, #tpu.memory_space<vmem>>, vector<1x32xbf16>
    %7 = arith.extf %6 : vector<1x32xbf16> to vector<1x32xf32>
    %8 = vector.broadcast %7 : vector<1x32xf32> to vector<16x32xf32>
    %9 = arith.addf %5, %8 : vector<16x32xf32>
    %10 = arith.truncf %9 : vector<16x32xf32> to vector<16x32xbf16>
    %c0_6 = arith.constant 0 : index
    %c0_7 = arith.constant 0 : index
    %11 = vector.load %arg7[%c0_6, %c0_7] : memref<16x32xbf16, #tpu.memory_space<vmem>>, vector<16x32xbf16>
    tpu.vector_store %arg7[%c0_6, %c0_7], %10 {strides = array<i32>} : memref<16x32xbf16, #tpu.memory_space<vmem>>, vector<16x32xbf16>,
    return
  }
  func.func @transform_0(%arg0: i32, %arg1: i32) -> (i32, i32) {
    %c0_i32 = arith.constant 0 : i32
    %c0_i32_0 = arith.constant 0 : i32
    return %arg0, %c0_i32 : i32, i32
  }
  func.func @transform_1(%arg0: i32, %arg1: i32) -> (i32, i32) {
    %c0_i32 = arith.constant 0 : i32
    %c0_i32_0 = arith.constant 0 : i32
    %c0_i32_1 = arith.constant 0 : i32
    return %c0_i32, %c0_i32_0 : i32, i32
  }
  func.func @transform_2(%arg0: i32, %arg1: i32) -> (i32, i32) {
    %c0_i32 = arith.constant 0 : i32
    %c0_i32_0 = arith.constant 0 : i32
    %c0_i32_1 = arith.constant 0 : i32
    return %c0_i32, %c0_i32_0 : i32, i32
  }
  func.func @transform_3(%arg0: i32, %arg1: i32) -> (i32, i32) {
    %c0_i32 = arith.constant 0 : i32
    %c0_i32_0 = arith.constant 0 : i32
    return %c0_i32, %arg1 : i32, i32
  }
  func.func @transform_4(%arg0: i32, %arg1: i32) -> (i32, i32) {
    %c0_i32 = arith.constant 0 : i32
    %c0_i32_0 = arith.constant 0 : i32
    return %c0_i32, %arg1 : i32, i32
  }
  func.func @transform_5(%arg0: i32, %arg1: i32) -> (i32, i32) {
    %c0_i32 = arith.constant 0 : i32
    return %arg0, %arg1 : i32, i32
  }
}

</mosaic_0001>

<bundles_post_ra>
// kernel: tpu_custom_call.1
= control target key start
LH: loop header
LB: loop body
LE: loop exit
PB: predicated region body
PF: predicated region fallthrough
CT: control target
= control target key end

     0   :  { %10 = vsyncpa [#allocation4], 0  ;;  %s545_s0 = inlined_call_operand.hbm [shape: bf16[16,32], index: 0, kind: input, shape index: {}]   ;;  %s546_s1 = inlined_call_operand.hbm [shape: f32[1,32], index: 1, kind: input, shape index: {}]   ;;  %s547_s2 = inlined_call_operand.hbm [shape: f32[1,32], index: 2, kind: input, shape index: {}]   ;;  %s548_s3 = inlined_call_operand.hbm [shape: bf16[32,32], index: 3, kind: input, shape index: {}]   ;;  %s549_s4 = inlined_call_operand.hbm [shape: bf16[1,32], index: 4, kind: input, shape index: {}]   ;;  %s550_s5 = inlined_call_operand.hbm [shape: bf16[16,32], index: 5, kind: output, shape index: {}]  }
   0x1   :  { %11 = vsyncpa [#allocation7], 0 }
   0x2   :  { %12 = vsyncpa [#allocation10], 0 }
   0x3   :  { %13 = vsyncpa [#allocation5], 0  ;;  %s418_s18 = smov [#allocation6]   ;;  %s278_s22 = scalar_lea.hbm %s546_s1, 16 }
   0x4   :  { %s32_s19 = sshll.u32 %s418_s18, 4  ;;  %p279_p0 = scmp.ne.s32.totalorder %s546_s1, %s278_s22  ;;  %s33_s19 = int_to_ptr.vmem [resolvable:$true] %s32_s19 }
   0x5   :  { %p282_p1 = scmp.lt.u32.totalorder %s278_s22, %s546_s1 }
   0x7   :  { %p284_p2 = pnand %p282_p1, %p279_p0 }
   0x9   :  { %287 = shalt.err (!%p284_p2)
}
   0xa   :  { %s288_s27 = scalar_lea.vmem %s33_s19, 16  ;;  %s292_s28 = scalar_lea.vmem %s33_s19, 32 }
   0xb   :  { %p289_p3 = scmp.ne.s32.totalorder %s33_s19, %s288_s27  ;;  %p293_p4 = scmp.lt.s32.totalorder %s33_s19, %s33_s19 }
   0xc   :  { %p294_p5 = scmp.lt.s32.totalorder %s292_s28, %s288_s27 }
   0xe   :  { %p295_p6 = por %p294_p5, %p293_p4 }
  0x10   :  { %p296_p7 = pnand %p295_p6, %p289_p3 }
  0x12   :  { %299 = shalt.err (!%p296_p7)
}
  0x13   :  { %35 = dma.hbm_to_vmem [thread:$0]  %s546_s1, 16, %s33_s19, [#allocation7]  }
  0x14   :  { %s419_s6 = smov [#allocation9]   ;;  %s420_s8 = smov [#allocation3]  }
  0x15   :  { %s51_s7 = sshll.u32 %s419_s6, 4  ;;  %s19_s9 = sshll.u32 %s420_s8, 4  ;;  %s52_s7 = int_to_ptr.vmem [resolvable:$true] %s51_s7  ;;  %s20_s9 = int_to_ptr.vmem [resolvable:$true] %s19_s9 }
  0x16   :  { %s300_s12 = scalar_lea.hbm %s548_s3, 256 }
  0x17   :  { %p301_p8 = scmp.ne.s32.totalorder %s548_s3, %s300_s12  ;;  %p304_p9 = scmp.lt.u32.totalorder %s300_s12, %s548_s3 }
  0x19   :  { %p306_p10 = pnand %p304_p9, %p301_p8 }
  0x1b   :  { %309 = shalt.err (!%p306_p10)
}
  0x1c   :  { %s310_s1 = scalar_lea.vmem %s52_s7, 256  ;;  %p315_p12 = scmp.lt.s32.totalorder %s52_s7, %s52_s7 }
  0x1d   :  { %p311_p11 = scmp.ne.s32.totalorder %s52_s7, %s310_s1  ;;  %p316_p13 = scmp.lt.s32.totalorder %s310_s1, %s310_s1 }
  0x1f   :  { %p317_p0 = por %p316_p13, %p315_p12 }
  0x21   :  { %p318_p1 = pnand %p317_p0, %p311_p11 }
  0x23   :  { %321 = shalt.err (!%p318_p1)
}
  0x24   :  { %s421_s17 = smov 64   ;;  %s422_s18 = smov 4  }
  0x25   :  { %57 = dma.hbm_to_vmem [thread:$0]  %s548_s3, 256, %s52_s7, [#allocation10], %s421_s17, %s421_s17, %s422_s18  }
  0x26   :  { %s322_s23 = scalar_lea.hbm %s545_s0, 128 }
  0x27   :  { %p323_p2 = scmp.ne.s32.totalorder %s545_s0, %s322_s23  ;;  %p326_p3 = scmp.lt.u32.totalorder %s322_s23, %s545_s0 }
  0x29   :  { %p328_p4 = pnand %p326_p3, %p323_p2 }
  0x2b   :  { %331 = shalt.err (!%p328_p4)
}
  0x2c   :  { %s332_s28 = scalar_lea.vmem %s20_s9, 128  ;;  %p337_p6 = scmp.lt.s32.totalorder %s20_s9, %s20_s9 }
  0x2d   :  { %p333_p5 = scmp.ne.s32.totalorder %s20_s9, %s332_s28  ;;  %p338_p7 = scmp.lt.s32.totalorder %s332_s28, %s332_s28 }
  0x2f   :  { %p339_p8 = por %p338_p7, %p337_p6 }
  0x31   :  { %p340_p9 = pnand %p339_p8, %p333_p5 }
  0x33   :  { %343 = shalt.err (!%p340_p9)
}
  0x34   :  { %25 = dma.hbm_to_vmem [thread:$0]  %s545_s0, 128, %s20_s9, [#allocation4], %s421_s17, %s421_s17, %s422_s18  }
  0x35   :  { %s423_s30 = smov [#allocation8]   ;;  %s424_s7 = smov [#allocation11]  }
  0x36   :  { %s42_s6 = sshll.u32 %s423_s30, 4  ;;  %s64_s8 = sshll.u32 %s424_s7, 4  ;;  %s43_s6 = int_to_ptr.vmem [resolvable:$true] %s42_s6  ;;  %s65_s8 = int_to_ptr.vmem [resolvable:$true] %s64_s8 }
  0x37   :  { %s344_s12 = scalar_lea.hbm %s547_s2, 16 }
  0x38   :  { %p345_p10 = scmp.ne.s32.totalorder %s547_s2, %s344_s12  ;;  %p348_p11 = scmp.lt.u32.totalorder %s344_s12, %s547_s2 }
  0x3a   :  { %p350_p12 = pnand %p348_p11, %p345_p10 }
  0x3c   :  { %353 = shalt.err (!%p350_p12)
}
  0x3d   :  { %s354_s0 = scalar_lea.vmem %s43_s6, 16  ;;  %s358_s9 = scalar_lea.vmem %s43_s6, 32 }
  0x3e   :  { %p355_p13 = scmp.ne.s32.totalorder %s43_s6, %s354_s0  ;;  %p359_p0 = scmp.lt.s32.totalorder %s43_s6, %s43_s6 }
  0x3f   :  { %p360_p1 = scmp.lt.s32.totalorder %s358_s9, %s354_s0 }
  0x41   :  { %p361_p2 = por %p360_p1, %p359_p0 }
  0x43   :  { %p362_p3 = pnand %p361_p2, %p355_p13 }
  0x45   :  { %365 = shalt.err (!%p362_p3)
}
  0x46   :  { %45 = dma.hbm_to_vmem [thread:$0]  %s547_s2, 16, %s43_s6, [#allocation7]  }
  0x47   :  { %s366_s22 = scalar_lea.hbm %s549_s4, 16 }
  0x48   :  { %p367_p4 = scmp.ne.s32.totalorder %s549_s4, %s366_s22  ;;  %p370_p5 = scmp.lt.u32.totalorder %s366_s22, %s549_s4 }
  0x4a   :  { %p372_p6 = pnand %p370_p5, %p367_p4 }
  0x4c   :  { %375 = shalt.err (!%p372_p6)
}
  0x4d   :  { %s376_s27 = scalar_lea.vmem %s65_s8, 16  ;;  %s380_s28 = scalar_lea.vmem %s65_s8, 32 }
  0x4e   :  { %p377_p7 = scmp.ne.s32.totalorder %s65_s8, %s376_s27  ;;  %p381_p8 = scmp.lt.s32.totalorder %s65_s8, %s65_s8 }
  0x4f   :  { %p382_p9 = scmp.lt.s32.totalorder %s380_s28, %s376_s27 }
  0x51   :  { %p383_p10 = por %p382_p9, %p381_p8 }
  0x53   :  { %p384_p11 = pnand %p383_p10, %p377_p7 }
  0x55   :  { %387 = shalt.err (!%p384_p11)
}
  0x56   :  { %67 = dma.hbm_to_vmem [thread:$0]  %s549_s4, 16, %s65_s8, [#allocation10]  }
  0x57   :  { %410 = dma.done.wait [#allocation4], 128  }
  0x58   :  { %411 = vsyncadd [#allocation4], 4294967168 }
  0x59   :  { %412 = dma.done.wait [#allocation7], 32  }
  0x5a   :  { %413 = vsyncadd [#allocation7], 4294967264 }
  0x5b   :  { %414 = dma.done.wait [#allocation10], 272  }
  0x5c   :  { %415 = vsyncadd [#allocation10], 4294967024  ;;  %v248_v0 = vld [vmem:[#allocation3] sm:$0xff]   ;;  %vm92_vm0 = vcmask 261120   ;;  %v272_v15 = vld [vmem:[#allocation9] sm:$0xff]   ;;  %v425_v16 = vmov 0.0   ;;  %v147_v36 = vlaneseq }
  0x5d   :  { %v249_v1 = vunpack.c.l.bf16 %v248_v0  ;;  %v250_v2 = vunpack.c.h.bf16 %v248_v0  ;;  %254 = vmatprep.subr.bf16.mxu0 %v425_v16  ;;  %v273_v17 = vld [vmem:[#allocation9 + $0x8] sm:$0xff]   ;;  %vm426_vm1 = vmmov 0   ;;  %v238_v26 = vld [vmem:[#allocation6] ss:$0 sm:$0xff]  ;;  %v239_v30 = vld [vmem:[#allocation8] ss:$0 sm:$0xff] }
  0x5e   :  { %255 = vmatpush3.bf16.msra.mxu0 %v272_v15  ;;  %258 = vmatprep.mubr.msk.bf16.mxu0 %vm426_vm1, %v425_v16  ;;  %v148_v37 = vshrl.u32 %v147_v36, 7  ;;  %v145_v38 = vld [vmem:[#allocation11] sm:$0x1]  ;;  %vm216_vm2 = vcmask 257024   ;;  %s427_s4 = smov [#allocation12]  }
  0x5f   :  { %v93_v3 = vsel %vm92_vm0, %v249_v1, 0.0  ;;  %v96_v4 = vsel %vm92_vm0, %v250_v2, 0.0  ;;  %256 = vmatprep.subr.bf16.mxu0 %v425_v16  ;;  %v146_v39 = vunpack.c.l.bf16 %v145_v38  ;;  %s224_s29 = sshll.u32 %s427_s4, 4  ;;  %s225_s29 = int_to_ptr.vmem [resolvable:$true] %s224_s29 }
  0x60   :  { %94 = vadd.xlane.f32.xlu0 %v93_v3  ;;  %v149_v40 = vsub.s32 0, %v148_v37  ;;  %s388_s30 = scalar_lea.vmem %s225_s29, 128  ;;  %p393_p13 = scmp.lt.s32.totalorder %s225_s29, %s225_s29 }
  0x61   :  { %p389_p12 = scmp.ne.s32.totalorder %s225_s29, %s388_s30  ;;  %p394_p0 = scmp.lt.s32.totalorder %s388_s30, %s388_s30 }
  0x62   :  { %257 = vmatpush3.bf16.msra.mxu0 %v273_v17  ;;  %v150_v41 = vrot.slane %v146_v39, %v149_v40 }
  0x63   :  { %p395_p1 = por %p394_p0, %p393_p13 }
  0x64   :  { %97 = vadd.xlane.f32.xlu0 %v96_v4 }
  0x65   :  { %p396_p2 = pnand %p395_p1, %p389_p12 }
  0xed   :  { %v95_v5 = vpop.xlane.xlu0 %94 }
  0xee   :  { %v100_v6 = vmul.f32 0.03125, %v95_v5 }
  0xf0   :  { %v102_v7 = vsub.f32 %v249_v1, %v100_v6 }
  0xf1   :  { %v98_v8 = vpop.xlane.xlu0 %97 }
  0xf2   :  { %v101_v9 = vmul.f32 0.03125, %v98_v8  ;;  %v104_v10 = vmul.f32 %v102_v7, %v102_v7 }
  0xf4   :  { %v103_v11 = vsub.f32 %v250_v2, %v101_v9  ;;  %v106_v12 = vsel %vm92_vm0, %v104_v10, 0.0 }
  0xf5   :  { %107 = vadd.xlane.f32.xlu1 %v106_v12 }
  0xf6   :  { %v105_v13 = vmul.f32 %v103_v11, %v103_v11 }
  0xf8   :  { %v109_v14 = vsel %vm92_vm0, %v105_v13, 0.0 }
  0xf9   :  { %110 = vadd.xlane.f32.xlu1 %v109_v14 }
 0x182   :  { %v108_v18 = vpop.xlane.xlu1 %107 }
 0x183   :  { %v112_v19 = vmul.f32 0.03125, %v108_v18 }
 0x185   :  { %v114_v20 = vadd.f32 1e-05, %v112_v19 }
 0x186   :  { %v111_v21 = vpop.xlane.xlu1 %110 }
 0x187   :  { %274 = vrsqrt.f32 %v114_v20  ;;  %v113_v22 = vmul.f32 0.03125, %v111_v21 }
 0x189   :  { %v115_v23 = vadd.f32 1e-05, %v113_v22 }
 0x18b   :  { %276 = vrsqrt.f32 %v115_v23 }
 0x191   :  { %v275_v24 = vpop.eup %274 }
 0x192   :  { %v118_v25 = vmul.f32 %v275_v24, %v102_v7 }
 0x194   :  { %v127_v28 = vmul.f32 %v238_v26, %v118_v25 }
 0x195   :  { %v277_v27 = vpop.eup %276 }
 0x196   :  { %v119_v29 = vmul.f32 %v277_v27, %v103_v11  ;;  %v136_v32 = vadd.f32 %v239_v30, %v127_v28 }
 0x198   :  { %v128_v31 = vmul.f32 %v238_v26, %v119_v29 }
 0x19a   :  { %v137_v33 = vadd.f32 %v239_v30, %v128_v31 }
 0x19c   :  { %v138_v34 = vpack.c.bf16 %v137_v33, %v136_v32 }
 0x19e   :  { %139 = vst.msk [vmem:[#allocation2] sm:$0xff] %vm92_vm0, %v138_v34 }
 0x1a5   :  { %v140_v35 = vld [vmem:[#allocation2] sm:$0xff] }
 0x1a6   :  { %259 = vmatmul.mubr.msk.bf16.vlgmr.msra.gmra.mrb[0].mxu0 %vm92_vm0, %v140_v35 }
 0x279   :  { %v201_v42 = vpop.f32.mrb[0].mxu0 }
 0x27a   :  { %v202_v43 = vadd.f32 %v201_v42, %v150_v41  ;;  %v260_v44 = vpop.f32.mrb[1].mxu0 }
 0x27b   :  { %v204_v45 = vpop.f32.mrb[2].mxu0 }
 0x27c   :  { %v245_v46 = vpack.c.bf16 %v202_v43, %v202_v43  ;;  %v205_v47 = vadd.f32 %v204_v45, %v150_v41  ;;  %v261_v48 = vpop.f32.mrb[3].mxu0 }
 0x27e   :  { %v246_v49 = vpack.c.bf16 %v205_v47, %v205_v47  ;;  %217 = vst.msk [vmem:[#allocation12] sm:$0xf] %vm216_vm2, %v245_v46 }
 0x280   :  { %218 = vst.msk [vmem:[#allocation12 + $0x4] sm:$0xf] %vm216_vm2, %v246_v49 }
 0x281   :  { %399 = shalt.err (!%p396_p2)
}
 0x282   :  { %s400_s8 = scalar_lea.hbm %s550_s5, 128 }
 0x283   :  { %p401_p3 = scmp.ne.s32.totalorder %s550_s5, %s400_s8  ;;  %p404_p4 = scmp.lt.u32.totalorder %s400_s8, %s550_s5 }
 0x285   :  { %p406_p5 = pnand %p404_p4, %p401_p3 }
 0x287   :  { %409 = shalt.err (!%p406_p5)
}
 0x288   :  { %230 = dma.vmem_to_hbm [thread:$0]  %s225_s29, 128, %s550_s5, [#allocation5], %s421_s17, %s421_s17, %s422_s18  }
 0x289   :  { %416 = dma.done.wait [#allocation5], 128  }
 0x28a   :  { %417 = vsyncadd [#allocation5], 4294967168 }
 0x28b   :  { %234 = vsyncpa [#allocation4], 1 }
 0x28c   :  { %235 = vsyncpa [#allocation7], 1 }
 0x28d   :  { %236 = vsyncpa [#allocation10], 1 }
 0x28e   :  { %237 = vsyncpa [#allocation5], 1 }

</bundles_post_ra>
